<compile_context>
chip_gen: v6e
topology: v6e:2x2x1
jax: 0.10.0
libtpu: 0.0.40
codegen_flags: <defaults>
</compile_context>

<pallas_src>
import numpy as np
import jax
import jax.numpy as jnp
from jax.experimental import pallas as pl
from jax.experimental.pallas import tpu as pltpu


# ----------------------------------------------------------------------------
# Kernel 1: fused lin_l / lin_r projection for one GATv2 layer.
#   xlr = x @ Wlr + blr   (bias added on the full-lane result, split once)
# Outputs xl (f32), xr (f32) and a bf16 copy of xl for the aggregation matmul.
# ----------------------------------------------------------------------------
def _project_kernel(x_ref, wlr_ref, blr_ref, xl_ref, xr_ref, xlb_ref):
    HC = xl_ref.shape[1]
    xb = x_ref[...].astype(jnp.bfloat16)
    xlr = jnp.dot(xb, wlr_ref[...], preferred_element_type=jnp.float32) + blr_ref[...]
    xl = xlr[:, :HC]
    xl_ref[...] = xl
    xr_ref[...] = xlr[:, HC:]
    xlb_ref[...] = xl.astype(jnp.bfloat16)


def _project(x, wlr, blr, hc):
    n = x.shape[0]
    return pl.pallas_call(
        _project_kernel,
        out_shape=(jax.ShapeDtypeStruct((n, hc), jnp.float32),
                   jax.ShapeDtypeStruct((n, hc), jnp.float32),
                   jax.ShapeDtypeStruct((n, hc), jnp.bfloat16)),
    )(x, wlr, blr)


# ----------------------------------------------------------------------------
# Kernel 2: GATv2 attention + aggregation, tiled over destination nodes.
# Per tile of Td dst nodes:
#   eemb = eflat_tile @ We                     (bf16 MXU, f32 acc)
#   s    = LeakyReLU(xr_d + xl_n + eemb)       (f32, (Td, N, HC))
#   logits = s @ att_blockdiag                 (one MXU matmul, all heads)
#   per head: softmax over sources (masked by adj), aggregate alpha @ xl_h
#   out  = ReLU(concat_heads + bias)           (activation fused)
# ----------------------------------------------------------------------------
def _attend_kernel(xl_ref, xr_ref, xlb_ref, adj_ref, ef_ref, we_ref,
                   attbd_ref, bias_ref, o_ref):
    N, HC = xl_ref.shape
    Td = xr_ref.shape[0]
    H = attbd_ref.shape[1]
    C = HC // H

    # Edge embedding for this dst tile (all heads fused, lane-dense output).
    eemb = jnp.dot(ef_ref[...], we_ref[...],
                   preferred_element_type=jnp.float32)            # (Td*N, HC)

    # GATv2 pre-activation: s[d, n, :] = xr[d] + xl[n] + eemb[d, n]
    s = (xr_ref[...].reshape(Td, 1, HC)
         + xl_ref[...].reshape(1, N, HC)
         + eemb.reshape(Td, N, HC))
    s = jnp.where(s >= 0, s, 0.2 * s)                             # LeakyReLU(0.2)

    # Attention logits for all heads via one MXU matmul against the
    # block-diagonal attention matrix: (Td*N, HC) @ (HC, H).
    logits = jnp.dot(s.reshape(Td * N, HC), attbd_ref[...],
                     preferred_element_type=jnp.float32).reshape(Td, N, H)

    adj = adj_ref[...]                                            # (Td, N) f32
    xlb = xlb_ref[...]                                            # (N, HC) bf16

    for h in range(H):                                            # H small, static
        lg = logits[:, :, h]                                      # (Td, N)
        m = jnp.max(lg, axis=1, keepdims=True)
        # exp(lg - m) <= 1; non-edges zeroed by the adjacency multiply only.
        p = jnp.exp(lg - m) * adj
        denom = jnp.maximum(jnp.sum(p, axis=1, keepdims=True), jnp.float32(1e-12))
        alpha = p * pl.reciprocal(denom, approx=True)
        # TODO(synk): attention dropout (attn_dropout_rate) is eval-mode identity.
        o_ref[:, h * C:(h + 1) * C] = jnp.dot(
            alpha.astype(jnp.bfloat16), xlb[:, h * C:(h + 1) * C],
            preferred_element_type=jnp.float32)

    # Output bias + ReLU (activation_func) fused, lane-dense over the tile.
    o_ref[...] = jnp.maximum(o_ref[...] + bias_ref[...], 0.0)


def _attend(xl, xr, xlb, adj, eflat, we, att_bd, bias, td):
    n, hc = xl.shape
    ed = eflat.shape[1]
    h = att_bd.shape[1]
    assert n % td == 0 and td % 8 == 0
    return pl.pallas_call(
        _attend_kernel,
        out_shape=jax.ShapeDtypeStruct((n, hc), jnp.float32),
        grid=(n // td,),
        in_specs=[
            pl.BlockSpec((n, hc), lambda i: (0, 0)),          # xl  (resident)
            pl.BlockSpec((td, hc), lambda i: (i, 0)),         # xr  dst-tile rows
            pl.BlockSpec((n, hc), lambda i: (0, 0)),          # xl bf16 (resident)
            pl.BlockSpec((td, n), lambda i: (i, 0)),          # adj dst-tile rows
            pl.BlockSpec((td * n, ed), lambda i: (i, 0)),     # eflat dst-major slab
            pl.BlockSpec((ed, hc), lambda i: (0, 0)),         # We
            pl.BlockSpec((hc, h), lambda i: (0, 0)),          # att block-diag
            pl.BlockSpec((1, hc), lambda i: (0, 0)),          # output bias
        ],
        out_specs=pl.BlockSpec((td, hc), lambda i: (i, 0)),
        compiler_params=pltpu.CompilerParams(
            dimension_semantics=("parallel",),                # both TCs on v7x
            vmem_limit_bytes=48 * 1024 * 1024),               # <= v7x 64 MiB
    )(xl, xr, xlb, adj, eflat, we, att_bd, bias)


# ----------------------------------------------------------------------------
# Kernel 3: global mean pool (row-normalized pooling matrix) + final FFN Linear
# ----------------------------------------------------------------------------
def _head_kernel(pool_ref, y_ref, w_ref, b_ref, o_ref):
    pooled = jnp.dot(pool_ref[...], y_ref[...], preferred_element_type=jnp.float32)
    o_ref[...] = jnp.dot(pooled, w_ref[...],
                         preferred_element_type=jnp.float32) + b_ref[...]


def _pool_ffn(pool_mat, y, ffn_w, ffn_b):
    g = pool_mat.shape[0]
    o = ffn_w.shape[1]
    return pl.pallas_call(
        _head_kernel,
        out_shape=jax.ShapeDtypeStruct((g, o), jnp.float32),
    )(pool_mat, y, ffn_w, ffn_b)


# ----------------------------------------------------------------------------
# Forward pass: conv layers (projection + attention) -> mean pool -> FFN.
# ----------------------------------------------------------------------------
def gat_forward(x, adj, eattr_flat, pool_mat, params, *, td=8):
    eflat = eattr_flat.astype(jnp.bfloat16)     # halve streamed HBM bytes
    h = x
    for (wlr, blr, we, att_bd, bias) in params['layers']:
        hc = bias.shape[1]
        xl, xr, xlb = _project(h, wlr, blr, hc)
        h = _attend(xl, xr, xlb, adj, eflat, we, att_bd, bias, td)
        # TODO(synk): feature Dropout(p=dropout_rate) between layers is eval-mode identity.
    # ffn_nlayers == 1, global_fdim None, add_batch_norm False:
    # ffn = Dropout (identity) + Linear(gnn_dim*heads, out_neurons)
    return _pool_ffn(pool_mat, h, params['ffn_w'], params['ffn_b'])


# ----------------------------------------------------------------------------
# Deterministic parameter init (per-head glorot, packed head-major on lanes).
# ----------------------------------------------------------------------------
def init_params(key, in_channels, gnn_dim, heads, edge_dim, out_neurons, nlayers):
    keys = iter(jax.random.split(key, 8 * nlayers + 8))
    H, C = heads, gnn_dim
    HC = H * C

    def glorot(k, shape):
        fan_in, fan_out = shape[-2], shape[-1]
        limit = (6.0 / (fan_in + fan_out)) ** 0.5
        return jax.random.uniform(k, shape, jnp.float32, -limit, limit)

    def conv_params(fin):
        Wl = glorot(next(keys), (H, fin, C))          # lin_l (per head)
        Wr = glorot(next(keys), (H, fin, C))          # lin_r (per head)
        We = glorot(next(keys), (H, edge_dim, C))     # lin_edge
        att = glorot(next(keys), (H, 1, C)).reshape(H, C)
        # head-major lane packing (matches PyG concat layout)
        Wl_all = jnp.transpose(Wl, (1, 0, 2)).reshape(fin, HC)
        Wr_all = jnp.transpose(Wr, (1, 0, 2)).reshape(fin, HC)
        We_all = jnp.transpose(We, (1, 0, 2)).reshape(edge_dim, HC)
        Wlr = jnp.concatenate([Wl_all, Wr_all], axis=1).astype(jnp.bfloat16)
        blr = jnp.zeros((1, 2 * HC), jnp.float32)     # [bl | br] packed
        # block-diagonal attention matrix: column h holds head h's att vector
        att_bd = jnp.zeros((HC, H), jnp.float32)
        for hh in range(H):
            att_bd = att_bd.at[hh * C:(hh + 1) * C, hh].set(att[hh])
        bias = jnp.zeros((1, HC), jnp.float32)
        return (Wlr, blr, We_all.astype(jnp.bfloat16), att_bd, bias)

    layers = [conv_params(in_channels)]
    layers += [conv_params(HC) for _ in range(nlayers - 1)]
    return {
        'layers': layers,
        'ffn_w': glorot(next(keys), (HC, out_neurons)),
        'ffn_b': jnp.zeros((1, out_neurons), jnp.float32),
    }


# ----------------------------------------------------------------------------
# Sparse graph -> dense adjacency / flat dense edge attrs (PyG GATv2Conv
# defaults: remove self loops, add self loops with fill_value='mean').
# Flat edge tensor is dst-major: row index = dst * N + src.
# ----------------------------------------------------------------------------
def densify_graph(edge_index, edge_attr, num_nodes):
    edge_index = np.asarray(edge_index)
    edge_attr = np.asarray(edge_attr, dtype=np.float32)
    ed = edge_attr.shape[1]
    A = np.zeros((num_nodes, num_nodes), np.float32)
    E = np.zeros((num_nodes, num_nodes, ed), np.float32)
    deg = np.zeros(num_nodes, np.float32)
    ssum = np.zeros((num_nodes, ed), np.float32)
    for e in range(edge_index.shape[1]):
        s, d = int(edge_index[0, e]), int(edge_index[1, e])
        if s == d:
            continue
        A[d, s] = 1.0
        E[d, s] = edge_attr[e]
        deg[d] += 1.0
        ssum[d] += edge_attr[e]
    for i in range(num_nodes):
        A[i, i] = 1.0
        if deg[i] > 0:
            E[i, i] = ssum[i] / deg[i]
    return (jnp.asarray(A),
            jnp.asarray(E.reshape(num_nodes * num_nodes, ed)))


if __name__ == "__main__":
    # small, GAT-consistent shapes
    N = 16               # nodes (2 graphs of 8 nodes)
    G = 2                # graphs
    in_channels = 8
    gnn_dim = 16         # gnn_hidden_neurons (per head)
    heads = 4
    edge_dim = 8
    gnn_nlayers = 2
    out_neurons = 1

    key = jax.random.PRNGKey(0)
    kx, ke, kp = jax.random.split(key, 3)

    # node features
    x = jax.random.normal(kx, (N, in_channels), jnp.float32)

    # bidirectional ring edges within each graph
    src, dst = [], []
    for g in range(G):
        base = g * 8
        for i in range(8):
            a, b = base + i, base + (i + 1) % 8
            src += [a, b]
            dst += [b, a]
    edge_index = np.stack([np.array(src), np.array(dst)])        # (2, 32)
    edge_attr = jax.random.normal(ke, (edge_index.shape[1], edge_dim), jnp.float32)

    # batch assignment and mean-pool matrix
    batch = np.array([0] * 8 + [1] * 8)
    pool_mat = np.zeros((G, N), np.float32)
    for n in range(N):
        pool_mat[batch[n], n] = 1.0
    pool_mat = pool_mat / pool_mat.sum(axis=1, keepdims=True)
    pool_mat = jnp.asarray(pool_mat)

    adj, eattr_flat = densify_graph(edge_index, edge_attr, N)

    params = init_params(kp, in_channels, gnn_dim, heads, edge_dim,
                         out_neurons, gnn_nlayers)

    out = gat_forward(x, adj, eattr_flat, pool_mat, params, td=8)
    out = jax.block_until_ready(out)
    assert out.shape == (G, out_neurons) and out.dtype == jnp.float32
    assert bool(jnp.all(jnp.isfinite(out)))
    print("KERNEL_OK")
</pallas_src>

<mosaic_0001>
module attributes {stable_mosaic.version = 11 : i64} {
  func.func @_project_kernel(%arg0: memref<16x8xf32, #tpu.memory_space<vmem>>, %arg1: memref<8x128xbf16, #tpu.memory_space<vmem>>, %arg2: memref<1x128xf32, #tpu.memory_space<vmem>>, %arg3: memref<16x64xf32, #tpu.memory_space<vmem>>, %arg4: memref<16x64xf32, #tpu.memory_space<vmem>>, %arg5: memref<16x64xbf16, #tpu.memory_space<vmem>>) attributes {dimension_semantics = [], scalar_prefetch = 0 : i64, scratch_operands = 0 : i64, tpu.core_type = #tpu.core_type<tc>} {
    %c0 = arith.constant 0 : index
    %c0_0 = arith.constant 0 : index
    %0 = vector.load %arg0[%c0, %c0_0] : memref<16x8xf32, #tpu.memory_space<vmem>>, vector<16x8xf32>
    %1 = arith.truncf %0 : vector<16x8xf32> to vector<16x8xbf16>
    %c0_1 = arith.constant 0 : index
    %c0_2 = arith.constant 0 : index
    %2 = vector.load %arg1[%c0_1, %c0_2] : memref<8x128xbf16, #tpu.memory_space<vmem>>, vector<8x128xbf16>
    %cst = arith.constant dense<0.000000e+00> : vector<16x128xf32>
    %3 = tpu.matmul %1, %2, %cst {dimension_numbers = #tpu.dot_dimension_numbers<[1], [0], [0], [1], [0, 0, 1, 1], [], []>} : vector<16x8xbf16>, vector<8x128xbf16>, vector<16x128xf32> -> vector<16x128xf32>
    %c0_3 = arith.constant 0 : index
    %c0_4 = arith.constant 0 : index
    %4 = vector.load %arg2[%c0_3, %c0_4] : memref<1x128xf32, #tpu.memory_space<vmem>>, vector<1x128xf32>
    %5 = vector.broadcast %4 : vector<1x128xf32> to vector<16x128xf32>
    %6 = arith.addf %3, %5 : vector<16x128xf32>
    %7 = vector.extract_strided_slice %6 {offsets = [0, 0], sizes = [16, 64], strides = [1, 1]} : vector<16x128xf32> to vector<16x64xf32>
    %c0_5 = arith.constant 0 : index
    %c0_6 = arith.constant 0 : index
    %8 = vector.load %arg3[%c0_5, %c0_6] : memref<16x64xf32, #tpu.memory_space<vmem>>, vector<16x64xf32>
    tpu.vector_store %arg3[%c0_5, %c0_6], %7 {strides = array<i32>} : memref<16x64xf32, #tpu.memory_space<vmem>>, vector<16x64xf32>,
    %9 = vector.extract_strided_slice %6 {offsets = [0, 64], sizes = [16, 64], strides = [1, 1]} : vector<16x128xf32> to vector<16x64xf32>
    %c0_7 = arith.constant 0 : index
    %c0_8 = arith.constant 0 : index
    %10 = vector.load %arg4[%c0_7, %c0_8] : memref<16x64xf32, #tpu.memory_space<vmem>>, vector<16x64xf32>
    tpu.vector_store %arg4[%c0_7, %c0_8], %9 {strides = array<i32>} : memref<16x64xf32, #tpu.memory_space<vmem>>, vector<16x64xf32>,
    %11 = arith.truncf %7 : vector<16x64xf32> to vector<16x64xbf16>
    %c0_9 = arith.constant 0 : index
    %c0_10 = arith.constant 0 : index
    %12 = vector.load %arg5[%c0_9, %c0_10] : memref<16x64xbf16, #tpu.memory_space<vmem>>, vector<16x64xbf16>
    tpu.vector_store %arg5[%c0_9, %c0_10], %11 {strides = array<i32>} : memref<16x64xbf16, #tpu.memory_space<vmem>>, vector<16x64xbf16>,
    return
  }
}

</mosaic_0001>

<bundles_post_ra>
// kernel: tpu_custom_call.1
= control target key start
LH: loop header
LB: loop body
LE: loop exit
PB: predicated region body
PF: predicated region fallthrough
CT: control target
= control target key end

     0   :  { %11 = vsyncpa [#allocation3], 0  ;;  %vm35_vm0 = vcmask 1043456   ;;  %v238_v2 = vmov 0.0   ;;  %vm239_vm1 = vmmov 0   ;;  %vm31_vm2 = vcmask 64512   ;;  %s308_s0 = inlined_call_operand.vmem [shape: f32[16,8], index: 0, kind: input, shape index: {}]   ;;  %s309_s1 = inlined_call_operand.vmem [shape: bf16[8,128], index: 1, kind: input, shape index: {}]   ;;  %s310_s2 = inlined_call_operand.vmem [shape: f32[1,128], index: 2, kind: input, shape index: {}]   ;;  %s311_s3 = inlined_call_operand.hbm [shape: f32[16,64], index: 3, kind: output, shape index: {0}]   ;;  %s312_s4 = inlined_call_operand.hbm [shape: f32[16,64], index: 4, kind: output, shape index: {1}]   ;;  %s313_s5 = inlined_call_operand.hbm [shape: bf16[16,64], index: 5, kind: output, shape index: {2}]  }
   0x1   :  { %v23_v0 = vld [vmem:[%s309_s1] sm:$0xf]  ;;  %159 = vmatprep.subr.bf16.mxu0 %v238_v2  ;;  %161 = vmatprep.mubr.msk.bf16.mxu0 %vm239_vm1, %v238_v2  ;;  %v21_v4 = vld [vmem:[%s308_s0 + $0x8] sm:$0xff] }
   0x2   :  { %v20_v1 = vld [vmem:[%s308_s0] sm:$0xff]  ;;  %v37_v3 = vsel %vm35_vm0, %v23_v0, 0 }
   0x3   :  { %160 = vmatpush3.bf16.msra.mxu0 %v37_v3  ;;  %v22_v5 = vpack.c.bf16 %v21_v4, %v20_v1 }
   0x4   :  { %12 = vsyncpa [#allocation5], 0  ;;  %v151_v6 = vld [vmem:[%s310_s2] ss:$0 sm:$0xff]  ;;  %vm80_vm3 = vcmask 523264   ;;  %vm101_vm4 = vcmask 519168  }
   0x5   :  { %s240_s25 = smov [#allocation2]   ;;  %s241_s27 = smov 64  }
   0x6   :  { %162 = vmatmul.mubr.msk.bf16.vlgmr.msra.gmra.mxu0 %vm31_vm2, %v22_v5  ;;  %s109_s26 = sshll.u32 %s240_s25, 4  ;;  %s110_s26 = int_to_ptr.vmem [resolvable:$true] %s109_s26 }
   0x7   :  { %s174_s0 = scalar_lea.vmem %s110_s26, 256  ;;  %p179_p1 = scmp.lt.s32.totalorder %s110_s26, %s110_s26 }
   0x8   :  { %p175_p0 = scmp.ne.s32.totalorder %s110_s26, %s174_s0  ;;  %p180_p2 = scmp.lt.s32.totalorder %s174_s0, %s174_s0 }
   0xa   :  { %p181_p3 = por %p180_p2, %p179_p1 }
   0xc   :  { %p182_p4 = pnand %p181_p3, %p175_p0 }
  0xc6   :  { %v73_v7 = vpop.f32.mrf.mxu0 }
  0xc7   :  { %v74_v8 = vadd.f32 %v151_v6, %v73_v7 }
  0xc8   :  { %v163_v9 = vpop.f32.mrf.mxu0 }
  0xc9   :  { %v155_v10 = vpack.c.bf16 %v74_v8, %v74_v8  ;;  %85 = vrot.lane.b32.xlu0 %v74_v8, %s241_s27  ;;  %81 = vst.msk [vmem:[#allocation2] sm:$0xff] %vm80_vm3, %v74_v8 }
  0xca   :  { %v76_v11 = vpop.f32.mrf.mxu0 }
  0xcb   :  { %102 = vst.msk [vmem:[#allocation6] sm:$0xf] %vm101_vm4, %v155_v10  ;;  %v77_v12 = vadd.f32 %v151_v6, %v76_v11 }
  0xcc   :  { %v164_v13 = vpop.f32.mrf.mxu0 }
  0xcd   :  { %v156_v14 = vpack.c.bf16 %v77_v12, %v77_v12  ;;  %87 = vrot.lane.b32.xlu0 %v77_v12, %s241_s27  ;;  %82 = vst.msk [vmem:[#allocation2 + $0x8] sm:$0xff] %vm80_vm3, %v77_v12 }
  0xce   :  { %185 = shalt.err (!%p182_p4)
}
  0xcf   :  { %s242_s2 = smov 128   ;;  %s243_s28 = smov 8   ;;  %103 = vst.msk [vmem:[#allocation6 + $0x4] sm:$0xf] %vm101_vm4, %v156_v14 }
  0xd0   :  { %115 = dma.vmem_to_hbm [thread:$0]  %s110_s26, 256, %s311_s3, [#allocation3], %s242_s2, %s242_s2, %s243_s28  }
  0xd1   :  { %s244_s6 = smov [#allocation4]   ;;  %s245_s8 = smov [#allocation6]  }
  0xd2   :  { %s121_s7 = sshll.u32 %s244_s6, 4  ;;  %s133_s9 = sshll.u32 %s245_s8, 4  ;;  %s122_s7 = int_to_ptr.vmem [resolvable:$true] %s121_s7  ;;  %s134_s9 = int_to_ptr.vmem [resolvable:$true] %s133_s9 }
  0xd3   :  { %s194_s10 = scalar_lea.vmem %s122_s7, 256  ;;  %p199_p6 = scmp.lt.s32.totalorder %s122_s7, %s122_s7 }
  0xd4   :  { %p195_p5 = scmp.ne.s32.totalorder %s122_s7, %s194_s10  ;;  %p200_p7 = scmp.lt.s32.totalorder %s194_s10, %s194_s10 }
  0xd6   :  { %p201_p8 = por %p200_p7, %p199_p6 }
  0xd8   :  { %p202_p9 = pnand %p201_p8, %p195_p5 }
 0x13b   :  { %v86_v15 = vpop.permute.xlu0 %85 }
 0x13c   :  { %91 = vst.msk [vmem:[#allocation4] sm:$0xff] %vm80_vm3, %v86_v15 }
 0x13f   :  { %v88_v16 = vpop.permute.xlu0 %87 }
 0x140   :  { %92 = vst.msk [vmem:[#allocation4 + $0x8] sm:$0xff] %vm80_vm3, %v88_v16 }
 0x141   :  { %205 = shalt.err (!%p202_p9)
}
 0x142   :  { %127 = dma.vmem_to_hbm [thread:$0]  %s122_s7, 256, %s312_s4, [#allocation5], %s242_s2, %s242_s2, %s243_s28  }
 0x143   :  { %s214_s12 = scalar_lea.vmem %s134_s9, 128  ;;  %p219_p11 = scmp.lt.s32.totalorder %s134_s9, %s134_s9 }
 0x144   :  { %p215_p10 = scmp.ne.s32.totalorder %s134_s9, %s214_s12  ;;  %p220_p12 = scmp.lt.s32.totalorder %s214_s12, %s214_s12 }
 0x146   :  { %p221_p13 = por %p220_p12, %p219_p11 }
 0x148   :  { %p222_p0 = pnand %p221_p13, %p215_p10 }
 0x14a   :  { %225 = shalt.err (!%p222_p0)
}
 0x14b   :  { %s246_s13 = smov 4  }
 0x14c   :  { %139 = dma.vmem_to_hbm [thread:$0]  %s134_s9, 128, %s313_s5, [#allocation5], %s241_s27, %s241_s27, %s246_s13  }
 0x14d   :  { %234 = dma.done.wait [#allocation3], 256  }
 0x14e   :  { %235 = vsyncadd [#allocation3], 4294967040 }
 0x14f   :  { %236 = dma.done.wait [#allocation5], 384  }
 0x150   :  { %237 = vsyncadd [#allocation5], 4294966912 }
 0x151   :  { %149 = vsyncpa [#allocation3], 1 }
 0x152   :  { %150 = vsyncpa [#allocation5], 1 }

</bundles_post_ra>
